<compile_context>
chip_gen: v7x
topology: tpu7x:2x2x1
jax: 0.10.0
libtpu: 0.0.40
codegen_flags: <defaults>
</compile_context>

<pallas_src>
import jax
import jax.numpy as jnp
from jax.experimental import pallas as pl
from jax.experimental.pallas import tpu as pltpu

HIDDEN = 128    # GCN hidden_channels (already lane-dense)
OUT_PAD = 128   # pad out_channels to a full lane width for unmasked stores


# --------------------------------------------------------------------------- #
# Kernels
# --------------------------------------------------------------------------- #
def _gcn_layer1_kernel(adj_ref, xw_ref, b1_ref, dis_ref, h_ref):
    """H_scaled[panel] = D^-1/2 * relu(D^-1/2 (A+I)[panel,:] (D^-1/2 X W1) + b1).

    adj_ref : (TM, Np)  bf16   binary (A + I) row panel
    xw_ref  : (Np, 128) bf16   D^-1/2 * (X @ W1), full resident
    b1_ref  : (1, 128)  f32
    dis_ref : (TM, 1)   f32    D^-1/2 for this row panel
    h_ref   : (TM, 128) bf16   output (pre-scaled by D^-1/2 for layer 2)
    """
    # bf16 x bf16 on the MXU, f32 accumulation.
    agg = jnp.dot(adj_ref[...], xw_ref[...], preferred_element_type=jnp.float32)
    conv = dis_ref[...] * agg + b1_ref[...]          # left D^-1/2 + bias (f32, VPU)
    h = jnp.maximum(conv, 0.0)                       # ReLU
    # Pre-scale rows by D^-1/2 so layer 2 only needs the left normalization.
    h_ref[...] = (dis_ref[...] * h).astype(h_ref.dtype)


def _gcn_layer2_kernel(adj_ref, hs_ref, w2_ref, b2_ref, dis_ref, o_ref):
    """out[panel] = (D^-1/2 (A+I)[panel,:] H_scaled) @ W2 + b2  (no final activation)."""
    agg = jnp.dot(adj_ref[...], hs_ref[...], preferred_element_type=jnp.float32)
    agg = dis_ref[...] * agg                         # left D^-1/2 (f32, VPU)
    o_ref[...] = (
        jnp.dot(agg.astype(jnp.bfloat16), w2_ref[...],
                preferred_element_type=jnp.float32)
        + b2_ref[...]
    )


# --------------------------------------------------------------------------- #
# Wrapper
# --------------------------------------------------------------------------- #
def _choose_tm(n_rounded):
    """Row-panel height: large enough to pipeline well, small enough that a
    double-buffered bf16 adjacency panel stays well inside scoped VMEM on every
    generation (v7x has only 64 MiB physical / 32 MiB default scoped)."""
    budget_bytes = 4 * 1024 * 1024           # per adjacency panel (x2 double buffer)
    tm = 128
    while tm > 8 and tm * n_rounded * 2 > budget_bytes:
        tm //= 2
    return tm


def gnn_with_embedding_forward(x_ids, edge_index, params):
    emb_table, w1, b1, w2, b2 = params
    n = int(x_ids.shape[0])
    out_dim = int(w2.shape[1])

    tm = _choose_tm(max(8, -(-n // 8) * 8))
    np_ = -(-n // tm) * tm                   # node count padded to a multiple of TM

    # --- glue (plain JAX): binary (A + I) emitted directly in bf16, degrees in f32 ---
    src, dst = edge_index[0], edge_index[1]
    deg = jnp.zeros((np_,), jnp.float32).at[dst].add(
        jnp.ones(src.shape, jnp.float32)) + 1.0          # in-degree + self-loop >= 1
    d_inv_sqrt = jax.lax.rsqrt(deg)                      # [Np] f32 (exact normalization)
    # Duplicate edges sum (matches PyG gcn_norm); edge_index is assumed self-loop free.
    adj = (jnp.zeros((np_, np_), jnp.bfloat16).at[dst, src].add(1.0)
           + jnp.eye(np_, dtype=jnp.bfloat16))           # small ints: exact in bf16
    dis = d_inv_sqrt[:, None]                            # [Np, 1] f32

    # --- glue: fold the embedding gather with W1 (removes the K=32 matmul) ---
    xw1 = (emb_table @ w1)[x_ids]                        # [n, 128] f32
    xw1 = jnp.pad(xw1, ((0, np_ - n), (0, 0)))
    xw1_scaled = (dis * xw1).astype(jnp.bfloat16)        # right D^-1/2 applied in f32

    b1r = b1.reshape(1, HIDDEN).astype(jnp.float32)
    w2p = jnp.zeros((HIDDEN, OUT_PAD), jnp.float32).at[:, :out_dim].set(w2)
    w2p = w2p.astype(jnp.bfloat16)
    b2p = jnp.zeros((1, OUT_PAD), jnp.float32).at[0, :out_dim].set(b2)

    grid = (np_ // tm,)
    cparams = pltpu.CompilerParams(
        dimension_semantics=("parallel",),               # 2x on v7x megacore, free elsewhere
        vmem_limit_bytes=32 * 1024 * 1024,
    )

    adj_spec = pl.BlockSpec((tm, np_), lambda i: (i, 0))
    dis_spec = pl.BlockSpec((tm, 1), lambda i: (i, 0))

    def full(r, c):
        return pl.BlockSpec((r, c), lambda i: (0, 0))

    # ---- Layer 1: H_scaled [Np, 128] bf16 ----
    h_scaled = pl.pallas_call(
        _gcn_layer1_kernel,
        out_shape=jax.ShapeDtypeStruct((np_, HIDDEN), jnp.bfloat16),
        grid_spec=pltpu.PrefetchScalarGridSpec(
            num_scalar_prefetch=0,
            grid=grid,
            in_specs=[adj_spec, full(np_, HIDDEN), full(1, HIDDEN), dis_spec],
            out_specs=pl.BlockSpec((tm, HIDDEN), lambda i: (i, 0)),
        ),
        compiler_params=cparams,
    )(adj, xw1_scaled, b1r, dis)

    # ---- Layer 2: out [Np, OUT_PAD] f32 (lane-dense store) ----
    out_padded = pl.pallas_call(
        _gcn_layer2_kernel,
        out_shape=jax.ShapeDtypeStruct((np_, OUT_PAD), jnp.float32),
        grid_spec=pltpu.PrefetchScalarGridSpec(
            num_scalar_prefetch=0,
            grid=grid,
            in_specs=[adj_spec, full(np_, HIDDEN), full(HIDDEN, OUT_PAD),
                      full(1, OUT_PAD), dis_spec],
            out_specs=pl.BlockSpec((tm, OUT_PAD), lambda i: (i, 0)),
        ),
        compiler_params=cparams,
    )(adj, h_scaled, w2p, b2p, dis)

    return out_padded[:n, :out_dim]


# --------------------------------------------------------------------------- #
# Parameters + pure-JAX f32 reference
# --------------------------------------------------------------------------- #
def init_params(key, num_embedding_rows, embedding_dim):
    """Deterministic synthetic parameters matching GNNWithEmbedding.__init__ shapes."""
    in_ch, hid_ch = 32, HIDDEN
    k_emb, k_w1, k_w2 = jax.random.split(key, 3)
    emb_table = jax.random.normal(k_emb, (num_embedding_rows, in_ch), jnp.float32)
    w1 = jax.random.uniform(k_w1, (in_ch, hid_ch), jnp.float32, -1.0, 1.0) * jnp.sqrt(
        6.0 / (in_ch + hid_ch))
    b1 = jnp.zeros((hid_ch,), jnp.float32)
    w2 = jax.random.uniform(k_w2, (hid_ch, embedding_dim), jnp.float32, -1.0, 1.0
                            ) * jnp.sqrt(6.0 / (hid_ch + embedding_dim))
    b2 = jnp.zeros((embedding_dim,), jnp.float32)
    return emb_table, w1, b1, w2, b2


def _reference_forward(x_ids, edge_index, params):
    """Pure-JAX f32 reference of the 2-layer GCN (for a loose numeric check)."""
    emb_table, w1, b1, w2, b2 = params
    n = x_ids.shape[0]
    src, dst = edge_index[0], edge_index[1]
    a = jnp.zeros((n, n), jnp.float32).at[dst, src].add(1.0) + jnp.eye(n, dtype=jnp.float32)
    deg = a.sum(axis=1)
    dis = jnp.where(deg > 0, 1.0 / jnp.sqrt(deg), 0.0)
    a_hat = dis[:, None] * a * dis[None, :]
    x = emb_table[x_ids]
    h = jnp.maximum(a_hat @ (x @ w1) + b1, 0.0)
    return a_hat @ (h @ w2) + b2


# --------------------------------------------------------------------------- #
# Demo
# --------------------------------------------------------------------------- #
if __name__ == "__main__":
    key = jax.random.PRNGKey(0)
    num_embedding_rows = 256   # nn.Embedding(num_nodes=256, 32)
    n_graph_nodes = 256        # nodes in this graph (small, but exercises the row grid)
    embedding_dim = 16         # gnn out_channels

    k_ids, k_params = jax.random.split(key)
    params = init_params(k_params, num_embedding_rows, embedding_dim)

    # Node-id input for the embedding lookup.
    x_ids = jax.random.randint(k_ids, (n_graph_nodes,), 0, num_embedding_rows, jnp.int32)

    # Deterministic bidirectional ring graph: 2 * N directed edges, no self-loops.
    fwd = jnp.arange(n_graph_nodes, dtype=jnp.int32)
    nxt = (fwd + 1) % n_graph_nodes
    edge_index = jnp.stack(
        [jnp.concatenate([fwd, nxt]), jnp.concatenate([nxt, fwd])], axis=0
    )  # [2, 512]

    out = gnn_with_embedding_forward(x_ids, edge_index, params)
    out = jax.block_until_ready(out)

    assert out.shape == (n_graph_nodes, embedding_dim)
    assert out.dtype == jnp.float32
    assert bool(jnp.all(jnp.isfinite(out)))

    ref = _reference_forward(x_ids, edge_index, params)
    err = float(jnp.max(jnp.abs(out - ref)))
    assert err < 1e-1, f"mismatch vs f32 reference: max abs err = {err}"

    print("KERNEL_OK")
</pallas_src>

<mosaic_0001>
module attributes {stable_mosaic.version = 11 : i64} {
  func.func @_gcn_layer1_kernel(%arg0: i32, %arg1: memref<128x256xbf16, #tpu.memory_space<vmem>>, %arg2: memref<256x128xbf16, #tpu.memory_space<vmem>>, %arg3: memref<1x128xf32, #tpu.memory_space<vmem>>, %arg4: memref<128x1xf32, #tpu.memory_space<vmem>>, %arg5: memref<128x128xbf16, #tpu.memory_space<vmem>>) attributes {dimension_semantics = [#tpu.dimension_semantics<parallel>], iteration_bounds = array<i64: 2>, scalar_prefetch = 0 : i64, scratch_operands = 0 : i64, tpu.core_type = #tpu.core_type<tc>, window_params = [{transform_indices = @transform_0, window_bounds = array<i64: 128, 256>}, {pipeline_mode = #tpu.pipeline_mode<synchronous>, transform_indices = @transform_1, window_bounds = array<i64: 256, 128>}, {pipeline_mode = #tpu.pipeline_mode<synchronous>, transform_indices = @transform_2, window_bounds = array<i64: 1, 128>}, {transform_indices = @transform_3, window_bounds = array<i64: 128, 1>}, {transform_indices = @transform_4, window_bounds = array<i64: 128, 128>}]} {
    %c0 = arith.constant 0 : index
    %c0_0 = arith.constant 0 : index
    %0 = vector.load %arg1[%c0, %c0_0] : memref<128x256xbf16, #tpu.memory_space<vmem>>, vector<128x256xbf16>
    %c0_1 = arith.constant 0 : index
    %c0_2 = arith.constant 0 : index
    %1 = vector.load %arg2[%c0_1, %c0_2] : memref<256x128xbf16, #tpu.memory_space<vmem>>, vector<256x128xbf16>
    %cst = arith.constant dense<0.000000e+00> : vector<128x128xf32>
    %2 = tpu.matmul %0, %1, %cst {dimension_numbers = #tpu.dot_dimension_numbers<[1], [0], [0], [1], [0, 0, 1, 1], [], []>} : vector<128x256xbf16>, vector<256x128xbf16>, vector<128x128xf32> -> vector<128x128xf32>
    %c0_3 = arith.constant 0 : index
    %c0_4 = arith.constant 0 : index
    %3 = vector.load %arg4[%c0_3, %c0_4] : memref<128x1xf32, #tpu.memory_space<vmem>>, vector<128x1xf32>
    %4 = vector.broadcast %3 : vector<128x1xf32> to vector<128x128xf32>
    %5 = arith.mulf %4, %2 : vector<128x128xf32>
    %c0_5 = arith.constant 0 : index
    %c0_6 = arith.constant 0 : index
    %6 = vector.load %arg3[%c0_5, %c0_6] : memref<1x128xf32, #tpu.memory_space<vmem>>, vector<1x128xf32>
    %7 = vector.broadcast %6 : vector<1x128xf32> to vector<128x128xf32>
    %8 = arith.addf %5, %7 : vector<128x128xf32>
    %cst_7 = arith.constant 0.000000e+00 : f32
    %9 = vector.broadcast %cst_7 : f32 to vector<128x128xf32>
    %10 = arith.maximumf %8, %9 : vector<128x128xf32>
    %c0_8 = arith.constant 0 : index
    %c0_9 = arith.constant 0 : index
    %11 = vector.load %arg4[%c0_8, %c0_9] : memref<128x1xf32, #tpu.memory_space<vmem>>, vector<128x1xf32>
    %12 = vector.broadcast %11 : vector<128x1xf32> to vector<128x128xf32>
    %13 = arith.mulf %12, %10 : vector<128x128xf32>
    %14 = arith.truncf %13 : vector<128x128xf32> to vector<128x128xbf16>
    %c0_10 = arith.constant 0 : index
    %c0_11 = arith.constant 0 : index
    %15 = vector.load %arg5[%c0_10, %c0_11] : memref<128x128xbf16, #tpu.memory_space<vmem>>, vector<128x128xbf16>
    tpu.vector_store %arg5[%c0_10, %c0_11], %14 {strides = array<i32>} : memref<128x128xbf16, #tpu.memory_space<vmem>>, vector<128x128xbf16>,
    return
  }
  func.func @transform_0(%arg0: i32) -> (i32, i32) {
    %c0_i32 = arith.constant 0 : i32
    %c0_i32_0 = arith.constant 0 : i32
    return %arg0, %c0_i32 : i32, i32
  }
  func.func @transform_1(%arg0: i32) -> (i32, i32) {
    %c0_i32 = arith.constant 0 : i32
    %c0_i32_0 = arith.constant 0 : i32
    %c0_i32_1 = arith.constant 0 : i32
    return %c0_i32, %c0_i32_0 : i32, i32
  }
  func.func @transform_2(%arg0: i32) -> (i32, i32) {
    %c0_i32 = arith.constant 0 : i32
    %c0_i32_0 = arith.constant 0 : i32
    %c0_i32_1 = arith.constant 0 : i32
    return %c0_i32, %c0_i32_0 : i32, i32
  }
  func.func @transform_3(%arg0: i32) -> (i32, i32) {
    %c0_i32 = arith.constant 0 : i32
    %c0_i32_0 = arith.constant 0 : i32
    return %arg0, %c0_i32 : i32, i32
  }
  func.func @transform_4(%arg0: i32) -> (i32, i32) {
    %c0_i32 = arith.constant 0 : i32
    %c0_i32_0 = arith.constant 0 : i32
    return %arg0, %c0_i32 : i32, i32
  }
}

</mosaic_0001>

<bundles_post_ra>
// kernel: tpu_custom_call.1
= control target key start
LH: loop header
LB: loop body
LE: loop exit
PB: predicated region body
PF: predicated region fallthrough
CT: control target
= control target key end

     0   :  { %9 = vsyncpa [#allocation3], 0  ;;  %s1583_s0 = inlined_call_operand.vmem [shape: bf16[256,256], index: 0, kind: input, shape index: {}]   ;;  %s1584_s1 = inlined_call_operand.hbm [shape: bf16[256,128], index: 1, kind: input, shape index: {}]   ;;  %s1585_s2 = inlined_call_operand.vmem [shape: f32[1,128], index: 2, kind: input, shape index: {}]   ;;  %s1586_s3 = inlined_call_operand.vmem [shape: f32[256,1], index: 3, kind: input, shape index: {}]   ;;  %s1587_s4 = inlined_call_operand.hbm [shape: bf16[256,128], index: 4, kind: output, shape index: {}]  }
   0x1   :  { %10 = vsyncpa [#allocation4], 0 }
   0x2   :  { %12 = vsyncpa [#allocation4 + $0x1], 0  ;;  %s1344_s15 = smov 0   ;;  %s1346_s16 = smov 0  }
   0x3   :  { %s1348_s17 = smov 0   ;;  %s1350_s18 = smov 0  }
   0x4 LB: > { %s1365_s19 = sadd.s32 4294967295, %s1310_s18   ;;  %s908_s20 = sadd.s32 4294967294, %s1310_s18   ;;  %s1310_s18 = sphi %s1350_s18, %s1603_s18   ;;  %s1306_s17 = sphi %s1348_s17, %s1602_s17   ;;  %s1302_s16 = sphi %s1346_s16, %s1601_s16   ;;  %s1298_s15 = sphi %s1344_s15, %s1600_s15  }
   0x5   : > { %s1369_s21 = sadd.s32 1, %s1310_s18   ;;  %s119_s22 = sadd.s32 1, %s1306_s17 }
   0x6   : > { %s116_s23 = ssub.s32 %s1310_s18, %s1369_s21  ;;  %p129_p0 = scmp.ne.s32.totalorder %s1306_s17, %s1302_s16 }
   0x7   : > { %p117_p1 = scmp.eq.s32.totalorder %s116_s23, 0  ;;  %p130_p2 = scmp.eq.s32.totalorder %s1365_s19, 1 }
   0x8   : > { %p135_p3 = scmp.ne.s32.totalorder %s1302_s16, %s1298_s15  ;;  %p136_p4 = scmp.eq.s32.totalorder %s908_s20, 1 }
   0x9   : > { %s1380_s24 = scalar_select %p117_p1, %s1306_s17, %s119_s22  }
   0xa   : > { %p1382_p5 = por %p130_p2, %p129_p0  ;;  %p1386_p6 = por %p136_p4, %p135_p3 }
   0xb   : > { %p909_p7 = scmp.ge.s32.totalorder %s1310_s18, 1  ;;  %p143_p8 = scmp.lt.s32.totalorder %s1310_s18, 3 }
   0xc   : > { %s1591_s25 = scalar_select %p1382_p5, 1, 0 }
   0xd   : > { %s1592_s26 = scalar_select %p1386_p6, 1, 0 }
   0xe   : > { %p1588_p9 = scmp.eq.s32.totalorder %s1365_s19, 0  ;;  %p1393_p10 = pnand %p909_p7, %p143_p8 }
   0xf   : > { %s1312_s28 = smov [#allocation2]   ;;  %s1216_s7 = scalar_lea.hbm %s1584_s1, 2048 }
  0x10   : > { %s1593_s27 = scalar_select %p1393_p10, 1, 0 }
  0x11   : > { %s155_s29 = sshll.u32 %s1312_s28, 4  ;;  %p1125_p11 = pneg %p1393_p10  ;;  %s156_s29 = int_to_ptr.vmem [resolvable:$true] %s155_s29 }
  0x12   : > { %p1217_p13 = scmp.ne.s32.totalorder %s1584_s1, %s1216_s7  ;;  %p1223_p3 = scmp.lt.u32.totalorder %s1216_s7, %s1584_s1 }
  0x13   : > { %p1401_p12 = pnand %p1588_p9, %p1125_p11 }
  0x15   : > { %p1218_p0 = pneg %p1401_p12 }
  0x17   : > { %p1219_p1 = pnand %p1218_p0, %p1217_p13 }
  0x19   : > { %p1220_p2 = pneg %p1219_p1 }
  0x1b   : > { %p1225_p4 = pnand %p1223_p3, %p1220_p2 }
  0x1d   : > { %1228 = shalt.err (!%p1225_p4)
}
  0x1e   : > { %s1229_s12 = scalar_lea.vmem %s156_s29, 2048  ;;  %p1237_p9 = scmp.lt.s32.totalorder %s156_s29, %s156_s29 }
  0x1f   : > { %p1230_p7 = scmp.ne.s32.totalorder %s156_s29, %s1229_s12  ;;  %p1238_p6 = scmp.lt.s32.totalorder %s1229_s12, %s1229_s12 }
  0x21   : > { %p1232_p8 = pnand %p1230_p7, %p1218_p0  ;;  %p1239_p5 = por %p1238_p6, %p1237_p9 }
  0x23   : > { %p1233_p11 = pneg %p1232_p8 }
  0x25   : > { %p1240_p10 = pnand %p1239_p5, %p1233_p11 }
  0x27   : > { %1243 = shalt.err (!%p1240_p10)
}
  0x28   : > { %s1313_s13 = smov 64   ;;  %s1314_s14 = smov 4  }
  0x29   : > { %1128 = dma.hbm_to_vmem [thread:$0]  (!%p1401_p12), %s1584_s1, 2048, %s156_s29, [#allocation3], %s1313_s13, %s1313_s13, %s1314_s14  }
  0x2a   : > { %p1595_p13 = scmp.ne.s32.totalorder %s1593_s27, 0 }
  0x2b   : > { %p1596_p1 = scmp.eq.s32.totalorder (!%p1595_p13), %s1365_s19, 0 }
  0x2c   : > { %193 = sbr.rel (%p1595_p13) target bundleno = 352 (0x160), region = 36 }
  0x33   : > { %1289 = dma.done.wait (%p1596_p1), [#allocation3], 2048   ;;  %p1597_p0 = pmov %p1596_p1 }
  0x34   : > { %v1315_v0 = vmov 0   ;;  %v1176_v1 = vld [vmem:[#allocation2 + $0x40] sm:$0xff]   ;;  %s915_s23 = sshll.u32 %s1365_s19, 4  ;;  %v1178_v3 = vld [vmem:[#allocation2 + $0x48] sm:$0xff]   ;;  %v1180_v5 = vld [vmem:[#allocation2 + $0x50] sm:$0xff]   ;;  %s222_s10 = sand.u32 1, %s1302_s16  }
  0x35   : > { %1291 = vsyncadd (%p1597_p0), [#allocation3], 4294965248  ;;  %1175 = vset.pattern.permute.xlu1 %v1315_v0  ;;  %1174 = vset.pattern.permute.xlu0 %v1315_v0  ;;  %v1177_v2 = vld [vmem:[#allocation2] sm:$0xff]   ;;  %v1179_v4 = vld [vmem:[#allocation2 + $0x8] sm:$0xff]   ;;  %p226_p5 = scmp.lt.s32.totalorder %s915_s23, 31  ;;  %s914_s11 = sshll.u32 %s222_s10, 6 }
  0x36   : > { %1039 = vmatprep.subr.bf16.mxu0 %v1176_v1  ;;  %1103 = vmatprep.subr.bf16.mxu1 %v1176_v1  ;;  %v1181_v6 = vld [vmem:[#allocation2 + $0x10] sm:$0xff]   ;;  %v1182_v7 = vld [vmem:[#allocation2 + $0x58] sm:$0xff]   ;;  %v1184_v9 = vld [vmem:[#allocation2 + $0x60] sm:$0xff]   ;;  %s1501_s12 = scalar_lea.vmem [#allocation5], %s914_s11  ;;  %s991_s13 = sshll.u32 %s1365_s19, 10 }
  0x37   : > { %1040 = vmatpush3.bf16.msra.mxu0 %v1177_v2  ;;  %1111 = vmatpush3.bf16.msra.mxu1 %v1177_v2  ;;  %s1605_s23 = smov (!%p226_p5, %s915_s23), 31  ;;  %v1183_v8 = vld [vmem:[#allocation2 + $0x18] sm:$0xff]   ;;  %v1185_v10 = vld [vmem:[#allocation2 + $0x20] sm:$0xff]   ;;  %v1186_v11 = vld [vmem:[#allocation2 + $0x68] sm:$0xff]   ;;  %s822_s14 = sshll.u32 %s1501_s12, 4  ;;  %s1536_s14 = int_to_ptr.vmem [resolvable:$true] %s822_s14 }
  0x38   : > { %1041 = vmatprep.subr.bf16.mxu0 %v1178_v3  ;;  %1104 = vmatprep.subr.bf16.mxu1 %v1178_v3  ;;  %s974_s27 = sshll.u32 %s1605_s23, 3  ;;  %v1187_v14 = vld [vmem:[#allocation2 + $0x28] sm:$0xff]   ;;  %v1188_v15 = vld [vmem:[#allocation2 + $0x70] sm:$0xff]   ;;  %v1190_v17 = vld [vmem:[#allocation2 + $0x78] sm:$0xff]   ;;  %s1534_s23 = scalar_lea.hbm %s1587_s4, %s991_s13 }
  0x39   : > { %s1434_s30 = scalar_lea.vmem %s1583_s0, %s974_s27  ;;  %v1189_v16 = vld [vmem:[#allocation2 + $0x30] sm:$0xff]   ;;  %s1441_s7 = scalar_lea.vmem %s1586_s3, %s974_s27  ;;  %v1191_v19 = vld [vmem:[#allocation2 + $0x38] sm:$0xff]   ;;  %v1488_v2 = vld [vmem:[%s1585_s2] ss:$0 sm:$0xff] }
  0x3a   : > { %v1194_v12 = vld [vmem:[%s1434_s30 + $0x4] ss:$8 sps:$4 sm:$0xff]   ;;  %v563_v18 = vld [vmem:[%s1441_s7 + $0x10] sm:$0xff]  ;;  %v1192_v21 = vld [vmem:[%s1434_s30] ss:$8 sps:$4 sm:$0xff]   ;;  %s1542_s19 = scalar_lea.sflag [#allocation4], %s222_s10 }
  0x3b   : > { %1042 = vmatpush3.bf16.msra.mxu0 %v1179_v4  ;;  %1112 = vmatpush3.bf16.msra.mxu1 %v1179_v4  ;;  %v1197_v13 = vld [vmem:[%s1434_s30 + $0x44] ss:$8 sps:$4 sm:$0xff]   ;;  %v1195_v22 = vld [vmem:[%s1434_s30 + $0x40] ss:$8 sps:$4 sm:$0xff]   ;;  %v564_v23 = vld [vmem:[%s1441_s7 + $0x18] sm:$0xff]  ;;  %s1244_s27 = scalar_lea.vmem %s1536_s14, 1024 }
  0x3c   : > { %1043 = vmatprep.subr.bf16.mxu0 %v1180_v5  ;;  %1105 = vmatprep.subr.bf16.mxu1 %v1180_v5  ;;  %v561_v20 = vld [vmem:[%s1441_s7] sm:$0xff]  ;;  %v562_v24 = vld [vmem:[%s1441_s7 + $0x8] sm:$0xff]  ;;  %v1198_v25 = vld [vmem:[%s1434_s30 + $0x14] ss:$8 sps:$4 sm:$0xff]   ;;  %p1245_p6 = scmp.ne.s32.totalorder %s1536_s14, %s1244_s27  ;;  %p1598_p9 = scmp.ne.s32.totalorder %s1591_s25, 0 }
  0x3d   : > { %496 = vmatprep.mubr.bf16.mxu0 %v1194_v12  ;;  %528 = vmatprep.mubr.bf16.mxu1 %v1197_v13  ;;  %v1200_v26 = vld [vmem:[%s1434_s30 + $0x54] ss:$8 sps:$4 sm:$0xff]   ;;  %v566_v27 = vld [vmem:[%s1441_s7 + $0x28] sm:$0xff]  ;;  %v565_v28 = vld [vmem:[%s1441_s7 + $0x20] sm:$0xff]  ;;  %s1316_s28 = smov [#allocation5]  }
  0x3e   : > { %589 = vperm.xlu1 %1175, %v563_v18   ;;  %579 = vperm.xlu0 %1174, %v561_v20   ;;  %v1202_v29 = vld [vmem:[%s1434_s30 + $0x10] ss:$8 sps:$4 sm:$0xff]   ;;  %v1204_v33 = vld [vmem:[%s1434_s30 + $0x24] ss:$8 sps:$4 sm:$0xff]   ;;  %v1208_v37 = vld [vmem:[%s1434_s30 + $0x20] ss:$8 sps:$4 sm:$0xff]   ;;  %p1246_p10 = pnand %p1245_p6, %p1598_p9 }
  0x3f   : > { %1044 = vmatpush3.bf16.msra.mxu0 %v1181_v6  ;;  %1113 = vmatpush3.bf16.msra.mxu1 %v1181_v6  ;;  %v1203_v30 = vld [vmem:[%s1434_s30 + $0x50] ss:$8 sps:$4 sm:$0xff]   ;;  %v1206_v34 = vld [vmem:[%s1434_s30 + $0x64] ss:$8 sps:$4 sm:$0xff]   ;;  %v1209_v38 = vld [vmem:[%s1434_s30 + $0x60] ss:$8 sps:$4 sm:$0xff]  }
  0x40   : > { %1045 = vmatprep.subr.bf16.mxu0 %v1182_v7  ;;  %1106 = vmatprep.subr.bf16.mxu1 %v1182_v7  ;;  %v568_v31 = vld [vmem:[%s1441_s7 + $0x38] sm:$0xff]  ;;  %v567_v32 = vld [vmem:[%s1441_s7 + $0x30] sm:$0xff]  ;;  %v570_v35 = vld [vmem:[%s1441_s7 + $0x48] sm:$0xff]  ;;  %p1247_p12 = pneg %p1246_p10  ;;  %s1248_s29 = sshll.u32 %s1316_s28, 4  ;;  %s1249_s29 = int_to_ptr.vmem [resolvable:$false] %s1248_s29 }
  0x41   : > { %v569_v36 = vld [vmem:[%s1441_s7 + $0x40] sm:$0xff]  ;;  %v572_v39 = vld [vmem:[%s1441_s7 + $0x58] sm:$0xff]  ;;  %v571_v40 = vld [vmem:[%s1441_s7 + $0x50] sm:$0xff]  ;;  %p1251_p2 = scmp.lt.s32.totalorder %s1536_s14, %s1249_s29 }
  0x42   : > { %594 = vperm.xlu1 %1175, %v564_v23   ;;  %584 = vperm.xlu0 %1174, %v562_v24   ;;  %v1210_v41 = vld [vmem:[%s1434_s30 + $0x34] ss:$8 sps:$4 sm:$0xff]   ;;  %v574_v43 = vld [vmem:[%s1441_s7 + $0x68] sm:$0xff]  ;;  %v573_v44 = vld [vmem:[%s1441_s7 + $0x60] sm:$0xff] }
  0x43   : > { %1046 = vmatpush3.bf16.msra.mxu0 %v1183_v8  ;;  %1114 = vmatpush3.bf16.msra.mxu1 %v1183_v8  ;;  %v1212_v42 = vld [vmem:[%s1434_s30 + $0x74] ss:$8 sps:$4 sm:$0xff]   ;;  %v1214_v45 = vld [vmem:[%s1434_s30 + $0x30] ss:$8 sps:$4 sm:$0xff]  }
  0x44   : > { %1047 = vmatprep.subr.bf16.mxu0 %v1184_v9  ;;  %1107 = vmatprep.subr.bf16.mxu1 %v1184_v9  ;;  %v1215_v46 = vld [vmem:[%s1434_s30 + $0x70] ss:$8 sps:$4 sm:$0xff]   ;;  %s1250_s30 = scalar_lea.vmem %s1249_s29, 2048 }
  0x45   : > { %v576_v47 = vld [vmem:[%s1441_s7 + $0x78] sm:$0xff]  ;;  %v575_v48 = vld [vmem:[%s1441_s7 + $0x70] sm:$0xff]  ;;  %p1252_p3 = scmp.lt.s32.totalorder %s1250_s30, %s1244_s27 }
  0x46   : > { %604 = vperm.xlu1 %1175, %v566_v27   ;;  %599 = vperm.xlu0 %1174, %v565_v28  }
  0x47   : > { %1048 = vmatpush3.bf16.msra.mxu0 %v1185_v10  ;;  %1115 = vmatpush3.bf16.msra.mxu1 %v1185_v10  ;;  %p1253_p4 = por %p1252_p3, %p1251_p2 }
  0x48   : > { %1049 = vmatprep.subr.bf16.mxu0 %v1186_v11  ;;  %1108 = vmatprep.subr.bf16.mxu1 %v1186_v11 }
  0x49   : > { %p1254_p7 = pnand %p1253_p4, %p1247_p12 }
  0x4a   : > { %614 = vperm.xlu1 %1175, %v568_v31   ;;  %609 = vperm.xlu0 %1174, %v567_v32  }
  0x4b   : > { %1050 = vmatpush3.bf16.msra.mxu0 %v1187_v14  ;;  %1116 = vmatpush3.bf16.msra.mxu1 %v1187_v14 }
  0x4c   : > { %1051 = vmatprep.subr.bf16.mxu0 %v1188_v15  ;;  %1109 = vmatprep.subr.bf16.mxu1 %v1188_v15 }
  0x4e   : > { %624 = vperm.xlu1 %1175, %v570_v35   ;;  %619 = vperm.xlu0 %1174, %v569_v36  }
  0x4f   : > { %1052 = vmatpush3.bf16.msra.mxu0 %v1189_v16  ;;  %1117 = vmatpush3.bf16.msra.mxu1 %v1189_v16 }
  0x50   : > { %1053 = vmatprep.subr.bf16.mxu0 %v1190_v17  ;;  %1110 = vmatprep.subr.bf16.mxu1 %v1190_v17 }
  0x52   : > { %634 = vperm.xlu1 %1175, %v572_v39   ;;  %629 = vperm.xlu0 %1174, %v571_v40  }
  0x53   : > { %1054 = vmatpush3.bf16.msra.mxu0 %v1191_v19  ;;  %1118 = vmatpush3.bf16.msra.mxu1 %v1191_v19 }
  0x56   : > { %497 = vmatmul.mubr.bf16.vlgmr.msra.gmra.mrb[0].mxu0 %v1192_v21  ;;  %529 = vmatmul.mubr.bf16.vlgmr.msra.gmra.mrb[0].mxu1 %v1195_v22 }
  0x57   : > { %504 = vmatprep.mubr.bf16.mxu0 %v1198_v25  ;;  %536 = vmatprep.mubr.bf16.mxu1 %v1200_v26 }
  0x58   : > { %644 = vperm.xlu1 %1175, %v574_v43   ;;  %639 = vperm.xlu0 %1174, %v573_v44  }
  0x5c   : > { %654 = vperm.xlu1 %1175, %v576_v47   ;;  %649 = vperm.xlu0 %1174, %v575_v48  }
  0x5e   : > { %505 = vmatmul.mubr.bf16.gmra.mrb[4].mxu0 %v1202_v29  ;;  %537 = vmatmul.mubr.bf16.gmra.mrb[4].mxu1 %v1203_v30 }
  0x5f   : > { %512 = vmatprep.mubr.bf16.mxu0 %v1204_v33  ;;  %544 = vmatprep.mubr.bf16.mxu1 %v1206_v34 }
  0x66   : > { %513 = vmatmul.mubr.bf16.gmra.mrb[8].mxu0 %v1208_v37  ;;  %545 = vmatmul.mubr.bf16.gmra.mrb[8].mxu1 %v1209_v38 }
  0x67   : > { %520 = vmatprep.mubr.bf16.mxu0 %v1210_v41  ;;  %552 = vmatprep.mubr.bf16.mxu1 %v1212_v42 }
  0x6e   : > { %521 = vmatmul.mubr.bf16.gmra.mrb[12].mxu0 %v1214_v45  ;;  %553 = vmatmul.mubr.bf16.gmra.mrb[12].mxu1 %v1215_v46 }
  0xbd   : > { %v580_v49 = vpop.permute.xlu0 %579  ;;  %v1473_v50 = vpop.permute.xlu1 %589 }
  0xc1   : > { %v585_v51 = vpop.permute.xlu0 %584  ;;  %v1475_v52 = vpop.permute.xlu1 %594 }
  0xc5   : > { %v1477_v53 = vpop.permute.xlu0 %599  ;;  %v1479_v54 = vpop.permute.xlu1 %604 }
  0xc9   : > { %v1481_v55 = vpop.permute.xlu0 %609  ;;  %v1483_v56 = vpop.permute.xlu1 %614 }
  0xcd   : > { %v620_v57 = vpop.permute.xlu0 %619  ;;  %v625_v9 = vpop.permute.xlu1 %624 }
  0xd1   : > { %v630_v14 = vpop.permute.xlu0 %629  ;;  %v635_v37 = vpop.permute.xlu1 %634 }
  0xd7   : > { %v640_v44 = vpop.permute.xlu0 %639 }
 0x129   : > { %v1055_v58 = vpop.f32.mrb[0].mxu0  ;;  %v1079_v59 = vpop.f32.mrb[0].mxu1 }
 0x12a   : > { %v1056_v60 = vpop.f32.mrb[1].mxu0  ;;  %v1080_v61 = vpop.f32.mrb[1].mxu1 }
 0x12b   : > { %v1057_v62 = vadd.f32 %v1056_v60, %v1055_v58  ;;  %v1081_v63 = vadd.f32 %v1080_v61, %v1079_v59  ;;  %v1058_v0 = vpop.f32.mrb[2].mxu0  ;;  %v1082_v1 = vpop.f32.mrb[2].mxu1 }
 0x12c   : > { %v1059_v3 = vpop.f32.mrb[3].mxu0  ;;  %v1083_v4 = vpop.f32.mrb[3].mxu1 }
 0x12d   : > { %v657_v5 = vmul.f32 %v1057_v62, %v580_v49  ;;  %v665_v6 = vmul.f32 %v1081_v63, %v620_v57  ;;  %v1060_v7 = vadd.f32 %v1059_v3, %v1058_v0  ;;  %v1084_v8 = vadd.f32 %v1083_v4, %v1082_v1 }
 0x12f   : > { %v680_v10 = vadd.f32 %v1488_v2, %v657_v5  ;;  %v688_v11 = vadd.f32 %v1488_v2, %v665_v6  ;;  %v658_v12 = vmul.f32 %v1060_v7, %v585_v51  ;;  %v666_v13 = vmul.f32 %v1084_v8, %v625_v9 }
 0x131   : > { %v696_v15 = vmax.f32 %v680_v10, 0.0  ;;  %v704_v16 = vmax.f32 %v688_v11, 0.0  ;;  %v681_v17 = vadd.f32 %v1488_v2, %v658_v12  ;;  %v689_v18 = vadd.f32 %v1488_v2, %v666_v13  ;;  %v1061_v19 = vpop.f32.mrb[4].mxu0  ;;  %v1085_v20 = vpop.f32.mrb[4].mxu1 }
 0x132   : > { %v1062_v21 = vpop.f32.mrb[5].mxu0  ;;  %v1086_v22 = vpop.f32.mrb[5].mxu1 }
 0x133   : > { %v697_v23 = vmax.f32 %v681_v17, 0.0  ;;  %v705_v24 = vmax.f32 %v689_v18, 0.0  ;;  %v1064_v25 = vpop.f32.mrb[6].mxu0  ;;  %v1088_v26 = vpop.f32.mrb[6].mxu1  ;;  %v712_v27 = vmul.f32 %v696_v15, %v580_v49  ;;  %v720_v28 = vmul.f32 %v704_v16, %v620_v57 }
 0x134   : > { %v1063_v29 = vadd.f32 %v1062_v21, %v1061_v19  ;;  %v1087_v30 = vadd.f32 %v1086_v22, %v1085_v20  ;;  %v1065_v31 = vpop.f32.mrb[7].mxu0  ;;  %v1089_v32 = vpop.f32.mrb[7].mxu1 }
 0x135   : > { %v713_v33 = vmul.f32 %v697_v23, %v585_v51  ;;  %v721_v34 = vmul.f32 %v705_v24, %v625_v9  ;;  %v1066_v35 = vadd.f32 %v1065_v31, %v1064_v25  ;;  %v1090_v36 = vadd.f32 %v1089_v32, %v1088_v26  ;;  %v645_v15 = vpop.permute.xlu1 %644 }
 0x136   : > { %v659_v38 = vmul.f32 %v1063_v29, %v1473_v50  ;;  %v667_v39 = vmul.f32 %v1087_v30, %v630_v14 }
 0x137   : > { %v995_v40 = vpack.c.bf16 %v713_v33, %v712_v27  ;;  %v1015_v41 = vpack.c.bf16 %v721_v34, %v720_v28  ;;  %v660_v42 = vmul.f32 %v1066_v35, %v1475_v52  ;;  %v668_v43 = vmul.f32 %v1090_v36, %v635_v37 }
 0x138   : > { %v682_v45 = vadd.f32 %v1488_v2, %v659_v38  ;;  %v690_v46 = vadd.f32 %v1488_v2, %v667_v39 }
 0x139   : > { %996 = vst [vmem:[%s1501_s12] sm:$0xff] %v995_v40   ;;  %1035 = vst [vmem:[%s1501_s12 + $0x20] sm:$0xff] %v1015_v41   ;;  %v683_v47 = vadd.f32 %v1488_v2, %v660_v42  ;;  %v691_v48 = vadd.f32 %v1488_v2, %v668_v43  ;;  %v1067_v49 = vpop.f32.mrb[8].mxu0  ;;  %v1091_v51 = vpop.f32.mrb[8].mxu1 }
 0x13a   : > { %v698_v57 = vmax.f32 %v682_v45, 0.0  ;;  %v706_v58 = vmax.f32 %v690_v46, 0.0  ;;  %v1068_v59 = vpop.f32.mrb[9].mxu0  ;;  %v1092_v60 = vpop.f32.mrb[9].mxu1 }
 0x13b   : > { %v699_v61 = vmax.f32 %v683_v47, 0.0  ;;  %v707_v62 = vmax.f32 %v691_v48, 0.0  ;;  %v1069_v63 = vadd.f32 %v1068_v59, %v1067_v49  ;;  %v1093_v0 = vadd.f32 %v1092_v60, %v1091_v51  ;;  %v1070_v1 = vpop.f32.mrb[10].mxu0  ;;  %v1094_v3 = vpop.f32.mrb[10].mxu1 }
 0x13c   : > { %v714_v4 = vmul.f32 %v698_v57, %v1473_v50  ;;  %v722_v5 = vmul.f32 %v706_v58, %v630_v14  ;;  %v1071_v6 = vpop.f32.mrb[11].mxu0  ;;  %v1095_v7 = vpop.f32.mrb[11].mxu1 }
 0x13d   : > { %v715_v8 = vmul.f32 %v699_v61, %v1475_v52  ;;  %v723_v9 = vmul.f32 %v707_v62, %v635_v37  ;;  %v661_v10 = vmul.f32 %v1069_v63, %v1477_v53  ;;  %v669_v11 = vmul.f32 %v1093_v0, %v640_v44  ;;  %v650_v14 = vpop.permute.xlu0 %649  ;;  %v655_v40 = vpop.permute.xlu1 %654 }
 0x13e   : > { %v1072_v12 = vadd.f32 %v1071_v6, %v1070_v1  ;;  %v1096_v13 = vadd.f32 %v1095_v7, %v1094_v3 }
 0x13f   : > { %v1000_v16 = vpack.c.bf16 %v715_v8, %v714_v4  ;;  %v1020_v17 = vpack.c.bf16 %v723_v9, %v722_v5  ;;  %v684_v18 = vadd.f32 %v1488_v2, %v661_v10  ;;  %v692_v50 = vadd.f32 %v1488_v2, %v669_v11 }
 0x140   : > { %v662_v19 = vmul.f32 %v1072_v12, %v1479_v54  ;;  %v670_v20 = vmul.f32 %v1096_v13, %v645_v15 }
 0x141   : > { %1032 = vst [vmem:[%s1501_s12 + $0x8] sm:$0xff] %v1000_v16   ;;  %1036 = vst [vmem:[%s1501_s12 + $0x28] sm:$0xff] %v1020_v17   ;;  %v1073_v52 = vpop.f32.mrb[12].mxu0  ;;  %v1097_v21 = vpop.f32.mrb[12].mxu1  ;;  %v700_v22 = vmax.f32 %v684_v18, 0.0  ;;  %v708_v23 = vmax.f32 %v692_v50, 0.0 }
 0x142   : > { %v685_v24 = vadd.f32 %v1488_v2, %v662_v19  ;;  %v693_v25 = vadd.f32 %v1488_v2, %v670_v20  ;;  %v1074_v26 = vpop.f32.mrb[13].mxu0  ;;  %v1098_v27 = vpop.f32.mrb[13].mxu1 }
 0x143   : > { %v1075_v28 = vadd.f32 %v1074_v26, %v1073_v52  ;;  %v1099_v29 = vadd.f32 %v1098_v27, %v1097_v21  ;;  %v1076_v30 = vpop.f32.mrb[14].mxu0  ;;  %v1100_v31 = vpop.f32.mrb[14].mxu1  ;;  %v716_v41 = vmul.f32 %v700_v22, %v1477_v53  ;;  %v724_v42 = vmul.f32 %v708_v23, %v640_v44 }
 0x144   : > { %v701_v32 = vmax.f32 %v685_v24, 0.0  ;;  %v709_v33 = vmax.f32 %v693_v25, 0.0  ;;  %v1077_v34 = vpop.f32.mrb[15].mxu0  ;;  %v1101_v35 = vpop.f32.mrb[15].mxu1 }
 0x145   : > { %v663_v36 = vmul.f32 %v1075_v28, %v1481_v55  ;;  %v671_v37 = vmul.f32 %v1099_v29, %v650_v14  ;;  %v1078_v38 = vadd.f32 %v1077_v34, %v1076_v30  ;;  %v1102_v39 = vadd.f32 %v1101_v35, %v1100_v31 }
 0x146   : > { %v717_v43 = vmul.f32 %v701_v32, %v1479_v54  ;;  %v725_v45 = vmul.f32 %v709_v33, %v645_v15 }
 0x147   : > { %v686_v46 = vadd.f32 %v1488_v2, %v663_v36  ;;  %v694_v47 = vadd.f32 %v1488_v2, %v671_v37  ;;  %v664_v48 = vmul.f32 %v1078_v38, %v1483_v56  ;;  %v672_v49 = vmul.f32 %v1102_v39, %v655_v40 }
 0x148   : > { %v1005_v51 = vpack.c.bf16 %v717_v43, %v716_v41  ;;  %v1025_v57 = vpack.c.bf16 %v725_v45, %v724_v42 }
 0x149   : > { %v702_v58 = vmax.f32 %v686_v46, 0.0  ;;  %v710_v59 = vmax.f32 %v694_v47, 0.0  ;;  %v687_v60 = vadd.f32 %v1488_v2, %v664_v48  ;;  %v695_v53 = vadd.f32 %v1488_v2, %v672_v49 }
 0x14a   : > { %1033 = vst [vmem:[%s1501_s12 + $0x10] sm:$0xff] %v1005_v51   ;;  %1037 = vst [vmem:[%s1501_s12 + $0x30] sm:$0xff] %v1025_v57  }
 0x14b   : > { %v703_v54 = vmax.f32 %v687_v60, 0.0  ;;  %v711_v44 = vmax.f32 %v695_v53, 0.0  ;;  %v718_v61 = vmul.f32 %v702_v58, %v1481_v55  ;;  %v726_v62 = vmul.f32 %v710_v59, %v650_v14 }
 0x14d   : > { %v719_v63 = vmul.f32 %v703_v54, %v1483_v56  ;;  %v727_v0 = vmul.f32 %v711_v44, %v655_v40 }
 0x14f   : > { %v1010_v2 = vpack.c.bf16 %v719_v63, %v718_v61  ;;  %v1030_v1 = vpack.c.bf16 %v727_v0, %v726_v62 }
 0x151   : > { %1034 = vst [vmem:[%s1501_s12 + $0x18] sm:$0xff] %v1010_v2   ;;  %1038 = vst [vmem:[%s1501_s12 + $0x38] sm:$0xff] %v1030_v1  }
 0x152   : > { %1257 = shalt.err (!%p1254_p7)
}
 0x153   : > { %s1258_s5 = scalar_lea.hbm %s1534_s23, 1024  ;;  %s1262_s8 = scalar_lea.hbm %s1587_s4, 2048 }
 0x154   : > { %p1259_p8 = scmp.ne.s32.totalorder %s1534_s23, %s1258_s5  ;;  %p1263_p1 = scmp.lt.u32.totalorder %s1534_s23, %s1587_s4 }
 0x155   : > { %p1264_p0 = scmp.lt.u32.totalorder %s1262_s8, %s1258_s5  ;;  %p1266_p6 = scmp.lt.u32.totalorder %s1258_s5, %s1534_s23 }
 0x156   : > { %p1260_p11 = pnand %p1259_p8, %p1598_p9 }
 0x157   : > { %p1265_p5 = por %p1264_p0, %p1263_p1 }
 0x158   : > { %p1261_p13 = pneg %p1260_p11 }
 0x159   : > { %p1267_p10 = por %p1266_p6, %p1265_p5 }
 0x15b   : > { %p1268_p12 = pnand %p1267_p10, %p1261_p13 }
 0x15d   : > { %1271 = shalt.err (!%p1268_p12)
}
 0x15e   : > { %s1317_s11 = smov 64   ;;  %s1318_s12 = smov 4  }
 0x15f   : > { %1123 = dma.vmem_to_hbm [thread:$0]  (%p1598_p9), %s1536_s14, 1024, %s1534_s23, %s1542_s19, %s1317_s11, %s1317_s11, %s1318_s12  }
 0x160 PF: > { %p1135_p2 = scmp.ge.s32.totalorder %s1310_s18, 2  ;;  %s837_s13 = sand.u32 1, %s1298_s15  }
 0x161   : > { %p1599_p3 = scmp.ne.s32.totalorder %s1592_s26, 0  ;;  %s838_s20 = scalar_lea.sflag [#allocation4], %s837_s13 }
 0x163   : > { %p1130_p4 = pnand %p1135_p2, %p1599_p3 }
 0x165   : > { %1293 = dma.done.wait (!%p1130_p4), %s838_s20, 1024  }
 0x166   : > { %1295 = vsyncadd (!%p1130_p4), %s838_s20, 4294966272  ;;  %p15_p7 = scmp.ge.s32.totalorder %s1369_s21, 4   ;;  %s1600_s15 = smov %s1302_s16 }
 0x167   : > { %s1601_s16 = smov %s1306_s17  ;;  %s1602_s17 = smov %s1380_s24 }
 0x168   : > { %s1603_s18 = smov %s1369_s21  ;;  %17 = sbr.rel (!%p15_p7) target bundleno = 4 (0x4), region = 79 }
 0x16f   :  { %843 = vsyncpa [#allocation3], 1 }
 0x170   :  { %845 = vsyncpa [#allocation3 + $0x1], 1 }
 0x171   :  { %846 = vsyncpa [#allocation4], 1 }
 0x172   :  { %848 = vsyncpa [#allocation4 + $0x1], 1 }

</bundles_post_ra>
